<compile_context>
chip_gen: v7x
topology: tpu7x:2x2x1
jax: 0.10.0
libtpu: 0.0.40
codegen_flags: <defaults>
</compile_context>

<pallas_src>
import functools
import math

import jax
import jax.numpy as jnp
from jax.experimental import pallas as pl
from jax.experimental.pallas import tpu as pltpu


def _kl_entropy_kernel(logits_ref, label_ref, sums_ref, *, n_class, batch):
    step = pl.program_id(0)

    @pl.when(step == 0)
    def _init():
        sums_ref[0] = jnp.float32(0.0)   # sum of per-row NLL
        sums_ref[1] = jnp.float32(0.0)   # sum of per-row KL * misclassified-mask
        sums_ref[2] = jnp.float32(0.0)   # count of misclassified rows

    x = logits_ref[...].astype(jnp.float32)       # (TB, C) logits (upcast in-reg)
    lbl = label_ref[...]                          # (TB, 1) int32
    tb, c = x.shape

    # log_softmax over classes (dim=1) — single exp pass on the EUP.
    m = jnp.max(x, axis=1, keepdims=True)
    e = jnp.exp(x - m)
    s = jnp.sum(e, axis=1, keepdims=True)
    log_s = jnp.log(s)
    logp = x - m - log_s                          # (TB, C)
    p = e * (1.0 / s)                             # == exp(logp), no 2nd exp

    col = jax.lax.broadcasted_iota(jnp.int32, (tb, c), 1)

    # argmax over classes (first max index, like torch.max(dim=1)[1]);
    # reuse m computed on x — same argmax as over log_softmax.
    pred = jnp.min(jnp.where(x == m, col, c), axis=1, keepdims=True)

    # per-row NLL: -logp[i, label[i]] (gather via one-hot)
    onehot = (col == lbl).astype(jnp.float32)
    nll_row = -jnp.sum(logp * onehot, axis=1, keepdims=True)

    # per-row KL: (1/n) * sum_c log((1/n) / (p_c + 1e-10))
    #           = (1/n) * (C*log(1/n) - sum_c log(p_c + 1e-10))   (no divides)
    inv_c = jnp.float32(1.0 / n_class)
    kl_const = jnp.float32(c * math.log(1.0 / n_class))
    kl_row = inv_c * (kl_const - jnp.sum(jnp.log(p + 1e-10), axis=1, keepdims=True))

    miscls = pred != lbl                          # (TB, 1) bool

    if batch % tb != 0:
        # Last tile is partial: mask out padded (garbage) rows.
        row_ids = step * tb + jax.lax.broadcasted_iota(jnp.int32, (tb, 1), 0)
        valid = row_ids < batch
        nll_row = jnp.where(valid, nll_row, 0.0)
        miscls = jnp.logical_and(miscls, valid)

    mask_f = miscls.astype(jnp.float32)
    kl_masked = jnp.where(miscls, kl_row, 0.0)

    sums_ref[0] = sums_ref[0] + jnp.sum(nll_row)
    sums_ref[1] = sums_ref[1] + jnp.sum(kl_masked)
    sums_ref[2] = sums_ref[2] + jnp.sum(mask_f)


def kl_entropy_loss(logits, label, *, n_class=100, beta=0.1, block_b=512):
    """loss, kl_mean — matches KLEntropyLoss.forward (incl. NaN kl_mean if no
    row is misclassified)."""
    B, C = logits.shape
    label2 = label.astype(jnp.int32).reshape(B, 1)

    # Batch tile: full batch if small (block == full dim is always legal),
    # otherwise a multiple-of-8 tile that keeps double-buffered blocks tiny
    # even on v7x's 64 MiB VMEM and enables pipelining over the batch.
    tb = B if B <= block_b else block_b
    grid = (pl.cdiv(B, tb),)

    kernel = functools.partial(_kl_entropy_kernel, n_class=n_class, batch=B)

    sums = pl.pallas_call(
        kernel,
        out_shape=jax.ShapeDtypeStruct((3,), jnp.float32),
        grid=grid,
        in_specs=[
            pl.BlockSpec((tb, C), lambda i: (i, 0)),   # logits tile
            pl.BlockSpec((tb, 1), lambda i: (i, 0)),   # labels tile
        ],
        out_specs=pl.BlockSpec(memory_space=pltpu.MemorySpace.SMEM),
        compiler_params=pltpu.CompilerParams(
            # batch grid axis accumulates into the SMEM output -> reduction axis
            dimension_semantics=("arbitrary",),
        ),
    )(logits, label2)

    nll = sums[0] / jnp.float32(B)
    kl_mean = sums[1] / sums[2]       # NaN when mask is empty, same as torch
    loss = nll - beta * kl_mean
    return loss, kl_mean


if __name__ == "__main__":
    key = jax.random.PRNGKey(0)
    k1, k2 = jax.random.split(key)
    B, C = 8, 100  # n_class=100 per module __init__
    logits = jax.random.normal(k1, (B, C), dtype=jnp.float32)
    label = jax.random.randint(k2, (B,), 0, C, dtype=jnp.int32)

    loss, kl_mean = kl_entropy_loss(logits, label, n_class=C, beta=0.1)
    jax.block_until_ready((loss, kl_mean))

    # plain-JAX reference check
    logp = jax.nn.log_softmax(logits, axis=1)
    mask = jnp.argmax(logp, axis=1) != label
    p = jnp.exp(logp)
    kl_rows = (1.0 / C) * jnp.sum(jnp.log((1.0 / C) / (p + 1e-10)), axis=1)
    kl_ref = jnp.sum(jnp.where(mask, kl_rows, 0.0)) / jnp.sum(mask)
    nll_ref = -jnp.mean(logp[jnp.arange(B), label])
    loss_ref = nll_ref - 0.1 * kl_ref

    assert jnp.allclose(kl_mean, kl_ref, atol=1e-5, rtol=1e-5), (kl_mean, kl_ref)
    assert jnp.allclose(loss, loss_ref, atol=1e-5, rtol=1e-5), (loss, loss_ref)
    print("KERNEL_OK")
</pallas_src>

<mosaic_0001>
module attributes {stable_mosaic.version = 11 : i64} {
  func.func @_kl_entropy_kernel(%arg0: i32, %arg1: memref<8x100xf32, #tpu.memory_space<vmem>>, %arg2: memref<8x1xi32, #tpu.memory_space<vmem>>, %arg3: memref<3xf32, #tpu.memory_space<smem>>) attributes {dimension_semantics = [#tpu.dimension_semantics<arbitrary>], iteration_bounds = array<i64: 1>, scalar_prefetch = 0 : i64, scratch_operands = 0 : i64, tpu.core_type = #tpu.core_type<tc>, window_params = [{transform_indices = @transform_0, window_bounds = array<i64: 8, 100>}, {transform_indices = @transform_1, window_bounds = array<i64: 8, 1>}, {transform_indices = @transform_2, window_bounds = array<i64: 3>}]} {
    %c0_i32 = arith.constant 0 : i32
    %0 = arith.cmpi eq, %arg0, %c0_i32 : i32
    %1 = arith.extui %0 : i1 to i32
    %c0_i32_0 = arith.constant 0 : i32
    %2 = arith.cmpi ne, %1, %c0_i32_0 : i32
    scf.if %2 {
      %cst_21 = arith.constant 0.000000e+00 : f32
      %c0_22 = arith.constant 0 : index
      %72 = memref.load %arg3[%c0_22] : memref<3xf32, #tpu.memory_space<smem>>
      memref.store %cst_21, %arg3[%c0_22] : memref<3xf32, #tpu.memory_space<smem>>
      %cst_23 = arith.constant 0.000000e+00 : f32
      %c1_24 = arith.constant 1 : index
      %73 = memref.load %arg3[%c1_24] : memref<3xf32, #tpu.memory_space<smem>>
      memref.store %cst_23, %arg3[%c1_24] : memref<3xf32, #tpu.memory_space<smem>>
      %cst_25 = arith.constant 0.000000e+00 : f32
      %c2_26 = arith.constant 2 : index
      %74 = memref.load %arg3[%c2_26] : memref<3xf32, #tpu.memory_space<smem>>
      memref.store %cst_25, %arg3[%c2_26] : memref<3xf32, #tpu.memory_space<smem>>
    } else {
    }
    %c0 = arith.constant 0 : index
    %c0_1 = arith.constant 0 : index
    %3 = vector.load %arg1[%c0, %c0_1] : memref<8x100xf32, #tpu.memory_space<vmem>>, vector<8x100xf32>
    %c0_2 = arith.constant 0 : index
    %c0_3 = arith.constant 0 : index
    %4 = vector.load %arg2[%c0_2, %c0_3] : memref<8x1xi32, #tpu.memory_space<vmem>>, vector<8x1xi32>
    %cst = arith.constant dense<0xFF800000> : vector<8xf32>
    %5 = vector.multi_reduction <maximumf>, %3, %cst [1] : vector<8x100xf32> to vector<8xf32>
    %6 = vector.shape_cast %5 : vector<8xf32> to vector<8x1xf32>
    %7 = vector.broadcast %6 : vector<8x1xf32> to vector<8x100xf32>
    %8 = arith.subf %3, %7 : vector<8x100xf32>
    %9 = math.exp %8 : vector<8x100xf32>
    %cst_4 = arith.constant dense<0.000000e+00> : vector<8xf32>
    %10 = vector.multi_reduction <add>, %9, %cst_4 [1] : vector<8x100xf32> to vector<8xf32>
    %11 = vector.shape_cast %10 : vector<8xf32> to vector<8x1xf32>
    %12 = math.log %11 : vector<8x1xf32>
    %13 = vector.broadcast %6 : vector<8x1xf32> to vector<8x100xf32>
    %14 = arith.subf %3, %13 : vector<8x100xf32>
    %15 = vector.broadcast %12 : vector<8x1xf32> to vector<8x100xf32>
    %16 = arith.subf %14, %15 : vector<8x100xf32>
    %cst_5 = arith.constant 1.000000e+00 : f32
    %17 = vector.broadcast %cst_5 : f32 to vector<8x1xf32>
    %18 = arith.divf %17, %11 : vector<8x1xf32>
    %19 = vector.broadcast %18 : vector<8x1xf32> to vector<8x100xf32>
    %20 = arith.mulf %9, %19 : vector<8x100xf32>
    %21 = tpu.iota {dimensions = array<i32: 1>} : vector<8x100xi32>
    %22 = vector.broadcast %6 : vector<8x1xf32> to vector<8x100xf32>
    %23 = arith.cmpf oeq, %3, %22 : vector<8x100xf32>
    %c100_i32 = arith.constant 100 : i32
    %24 = vector.broadcast %c100_i32 : i32 to vector<8x100xi32>
    %25 = arith.select %23, %21, %24 : vector<8x100xi1>, vector<8x100xi32>
    %cst_6 = arith.constant dense<2147483647> : vector<8xi32>
    %26 = vector.multi_reduction <minsi>, %25, %cst_6 [1] : vector<8x100xi32> to vector<8xi32>
    %27 = vector.shape_cast %26 : vector<8xi32> to vector<8x1xi32>
    %28 = vector.broadcast %4 : vector<8x1xi32> to vector<8x100xi32>
    %29 = arith.cmpi eq, %21, %28 : vector<8x100xi32>
    %30 = arith.extui %29 : vector<8x100xi1> to vector<8x100xi32>
    %31 = arith.sitofp %30 : vector<8x100xi32> to vector<8x100xf32>
    %32 = arith.mulf %16, %31 : vector<8x100xf32>
    %cst_7 = arith.constant dense<0.000000e+00> : vector<8xf32>
    %33 = vector.multi_reduction <add>, %32, %cst_7 [1] : vector<8x100xf32> to vector<8xf32>
    %34 = vector.shape_cast %33 : vector<8xf32> to vector<8x1xf32>
    %cst_8 = arith.constant 0.000000e+00 : f32
    %35 = vector.broadcast %cst_8 : f32 to vector<8x1xf32>
    %36 = arith.subf %35, %34 : vector<8x1xf32>
    %cst_9 = arith.constant 1.000000e-10 : f32
    %37 = vector.broadcast %cst_9 : f32 to vector<8x100xf32>
    %38 = arith.addf %20, %37 : vector<8x100xf32>
    %39 = math.log %38 : vector<8x100xf32>
    %cst_10 = arith.constant dense<0.000000e+00> : vector<8xf32>
    %40 = vector.multi_reduction <add>, %39, %cst_10 [1] : vector<8x100xf32> to vector<8xf32>
    %41 = vector.shape_cast %40 : vector<8xf32> to vector<8x1xf32>
    %cst_11 = arith.constant -460.517029 : f32
    %42 = vector.broadcast %cst_11 : f32 to vector<8x1xf32>
    %43 = arith.subf %42, %41 : vector<8x1xf32>
    %cst_12 = arith.constant 0.00999999977 : f32
    %44 = vector.broadcast %cst_12 : f32 to vector<8x1xf32>
    %45 = arith.mulf %44, %43 : vector<8x1xf32>
    %46 = arith.cmpi ne, %27, %4 : vector<8x1xi32>
    %47 = arith.extui %46 : vector<8x1xi1> to vector<8x1xi32>
    %48 = arith.sitofp %47 : vector<8x1xi32> to vector<8x1xf32>
    %cst_13 = arith.constant 0.000000e+00 : f32
    %49 = vector.broadcast %cst_13 : f32 to vector<8x1xf32>
    %50 = arith.select %46, %45, %49 : vector<8x1xi1>, vector<8x1xf32>
    %c0_14 = arith.constant 0 : index
    %51 = memref.load %arg3[%c0_14] : memref<3xf32, #tpu.memory_space<smem>>
    %52 = vector.shape_cast %36 : vector<8x1xf32> to vector<1x8x1xf32>
    %cst_15 = arith.constant dense<0.000000e+00> : vector<1xf32>
    %53 = vector.multi_reduction <add>, %52, %cst_15 [1, 2] : vector<1x8x1xf32> to vector<1xf32>
    %54 = vector.shape_cast %53 : vector<1xf32> to vector<1x1x1xf32>
    %55 = vector.extract %54[0, 0, 0] : f32 from vector<1x1x1xf32>
    %56 = arith.addf %51, %55 : f32
    %c0_16 = arith.constant 0 : index
    %57 = memref.load %arg3[%c0_16] : memref<3xf32, #tpu.memory_space<smem>>
    memref.store %56, %arg3[%c0_16] : memref<3xf32, #tpu.memory_space<smem>>
    %c1 = arith.constant 1 : index
    %58 = memref.load %arg3[%c1] : memref<3xf32, #tpu.memory_space<smem>>
    %59 = vector.shape_cast %50 : vector<8x1xf32> to vector<1x8x1xf32>
    %cst_17 = arith.constant dense<0.000000e+00> : vector<1xf32>
    %60 = vector.multi_reduction <add>, %59, %cst_17 [1, 2] : vector<1x8x1xf32> to vector<1xf32>
    %61 = vector.shape_cast %60 : vector<1xf32> to vector<1x1x1xf32>
    %62 = vector.extract %61[0, 0, 0] : f32 from vector<1x1x1xf32>
    %63 = arith.addf %58, %62 : f32
    %c1_18 = arith.constant 1 : index
    %64 = memref.load %arg3[%c1_18] : memref<3xf32, #tpu.memory_space<smem>>
    memref.store %63, %arg3[%c1_18] : memref<3xf32, #tpu.memory_space<smem>>
    %c2 = arith.constant 2 : index
    %65 = memref.load %arg3[%c2] : memref<3xf32, #tpu.memory_space<smem>>
    %66 = vector.shape_cast %48 : vector<8x1xf32> to vector<1x8x1xf32>
    %cst_19 = arith.constant dense<0.000000e+00> : vector<1xf32>
    %67 = vector.multi_reduction <add>, %66, %cst_19 [1, 2] : vector<1x8x1xf32> to vector<1xf32>
    %68 = vector.shape_cast %67 : vector<1xf32> to vector<1x1x1xf32>
    %69 = vector.extract %68[0, 0, 0] : f32 from vector<1x1x1xf32>
    %70 = arith.addf %65, %69 : f32
    %c2_20 = arith.constant 2 : index
    %71 = memref.load %arg3[%c2_20] : memref<3xf32, #tpu.memory_space<smem>>
    memref.store %70, %arg3[%c2_20] : memref<3xf32, #tpu.memory_space<smem>>
    return
  }
  func.func @transform_0(%arg0: i32) -> (i32, i32) {
    %c0_i32 = arith.constant 0 : i32
    %c0_i32_0 = arith.constant 0 : i32
    return %arg0, %c0_i32 : i32, i32
  }
  func.func @transform_1(%arg0: i32) -> (i32, i32) {
    %c0_i32 = arith.constant 0 : i32
    %c0_i32_0 = arith.constant 0 : i32
    return %arg0, %c0_i32 : i32, i32
  }
  func.func @transform_2(%arg0: i32) -> i32 {
    %c0_i32 = arith.constant 0 : i32
    %c0_i32_0 = arith.constant 0 : i32
    return %c0_i32 : i32
  }
}

</mosaic_0001>

<bundles_post_ra>
// kernel: tpu_custom_call.1
= control target key start
LH: loop header
LB: loop body
LE: loop exit
PB: predicated region body
PF: predicated region fallthrough
CT: control target
= control target key end

     0   :  { %vm24_vm0 = vcmask 818176   ;;  %s215_s0 = inlined_call_operand.vmem [shape: f32[8,100], index: 0, kind: input, shape index: {}]   ;;  %s216_s1 = inlined_call_operand.vmem [shape: s32[8,1], index: 1, kind: input, shape index: {}]   ;;  %s217_s2 = inlined_call_operand.hbm [shape: f32[3], index: 2, kind: output, shape index: {}]  }
   0x1   :  { %v22_v0 = vld [vmem:[%s215_s0] sm:$0xff] }
   0x2   :  { %7 = vsyncpa [#allocation3], 0  ;;  %v25_v1 = vsel %vm24_vm0, %v22_v0, -inf  ;;  %v174_v2 = vmov 0   ;;  %v40_v3 = vlaneseq  ;;  %v23_v14 = vld [vmem:[%s216_s1] sm:$0xff]  ;;  %v175_v28 = vmov 0.0  }
   0x3   :  { %26 = vmax.xlane.f32.xlu0 %v25_v1  ;;  %152 = vset.pattern.permute.xlu1 %v174_v2  ;;  %vm83_vm5 = vcmask 7168   ;;  %s162_s16 = scalar_lea.hbm %s217_s2, 16 }
   0x4   :  { %153 = vset.pattern.permute.xlu0 %v174_v2  ;;  %v41_v4 = vand.u32 127, %v40_v3  ;;  %p163_p0 = scmp.ne.s32.totalorder %s217_s2, %s162_s16  ;;  %p166_p1 = scmp.lt.u32.totalorder %s162_s16, %s217_s2 }
   0x6   :  { %p168_p2 = pnand %p166_p1, %p163_p0 }
  0x90   :  { %v27_v5 = vpop.xlane.xlu0 %26 }
  0x91   :  { %v28_v6 = vsub.f32 %v22_v0, %v27_v5  ;;  %vm42_vm1 = vcmp.eq.f32.partialorder %v22_v0, %v27_v5 }
  0x92   :  { %v43_v7 = vsel %vm42_vm1, %v41_v4, 100 }
  0x93   :  { %v29_v8 = vmul.f32 1.442695, %v28_v6  ;;  %v44_v9 = vsel %vm24_vm0, %v43_v7, 2147483647 }
  0x94   :  { %v46_v10 = vshra.s32 %v44_v9, 16  ;;  %v45_v15 = vand.u32 65535, %v44_v9 }
  0x95   :  { %154 = vpow2.f32 %v29_v8 }
  0x96   :  { %v48_v11 = vcvt.s32.f32 %v46_v10  ;;  %v47_v17 = vcvt.s32.f32 %v45_v15 }
  0x98   :  { %49 = vmin.xlane.f32.xlu1 %v48_v11 }
  0x9f   :  { %v155_v12 = vpop.eup %154 }
  0xa0   :  { %v31_v13 = vsel %vm24_vm0, %v155_v12, 0.0 }
  0xa1   :  { %32 = vadd.xlane.f32.xlu0 %v31_v13 }
  0xa9   :  { %60 = vperm.xlu1 %152, %v23_v14  }
 0x125   :  { %v50_v16 = vpop.xlane.xlu1 %49 }
 0x126   :  { %vm51_vm2 = vcmp.eq.f32.partialorder %v48_v11, %v50_v16  ;;  %v56_v35 = vcvt.f32.s32 %v50_v16 }
 0x127   :  { %v52_v18 = vsel %vm51_vm2, %v47_v17, inf }
 0x128   :  { %53 = vmin.xlane.f32.xlu0 %v52_v18  ;;  %v57_v37 = vshll.u32 %v56_v35, 16 }
 0x129   :  { %v61_v24 = vpop.permute.xlu1 %60 }
 0x12a   :  { %vm62_vm3 = vcmp.eq.s32.totalorder %v41_v4, %v61_v24 }
 0x12b   :  { %v138_v29 = vsel %vm62_vm3, 1.0, %v175_v28 }
 0x12e   :  { %v33_v19 = vpop.xlane.xlu0 %32 }
 0x12f   :  { %156 = vrcp.f32 %v33_v19 }
 0x130   :  { %158 = vlog2.f32 %v33_v19 }
 0x139   :  { %v157_v20 = vpop.eup %156 }
 0x13a   :  { %v39_v21 = vmul.f32 %v157_v20, %v155_v12  ;;  %v159_v23 = vpop.eup %158 }
 0x13b   :  { %v35_v25 = vmul.f32 0.6931472, %v159_v23 }
 0x13c   :  { %v70_v22 = vadd.f32 1e-10, %v39_v21 }
 0x13d   :  { %v36_v26 = vsub.f32 %v28_v6, %v35_v25 }
 0x13e   :  { %160 = vlog2.f32 %v70_v22 }
 0x13f   :  { %v65_v32 = vmul.f32 %v138_v29, %v36_v26 }
 0x141   :  { %v66_v33 = vsel %vm24_vm0, %v65_v32, 0.0 }
 0x148   :  { %v161_v27 = vpop.eup %160 }
 0x149   :  { %v72_v30 = vmul.f32 0.6931472, %v161_v27 }
 0x14b   :  { %v73_v31 = vsel %vm24_vm0, %v72_v30, 0.0 }
 0x14c   :  { %74 = vadd.xlane.f32.xlu0 %v73_v31 }
 0x150   :  { %67 = vadd.xlane.f32.xlu0 %v66_v33 }
 0x1b5   :  { %v54_v34 = vpop.xlane.xlu0 %53 }
 0x1b6   :  { %v55_v36 = vcvt.f32.s32 %v54_v34 }
 0x1b8   :  { %v58_v38 = vadd.s32 %v57_v37, %v55_v36 }
 0x1ba   :  { %vm78_vm4 = vcmp.ne.s32.totalorder %v58_v38, %v23_v14 }
 0x1bb   :  { %v139_v47 = vsel %vm78_vm4, 1.0, %v175_v28 }
 0x1bc   :  { %v112_v48 = vsel %vm83_vm5, %v139_v47, 0.0 }
 0x1d9   :  { %v75_v39 = vpop.xlane.xlu0 %74 }
 0x1da   :  { %v76_v40 = vsub.f32 -460.51703, %v75_v39 }
 0x1dc   :  { %v77_v41 = vmul.f32 0.01, %v76_v40 }
 0x1dd   :  { %v68_v42 = vpop.xlane.xlu0 %67 }
 0x1de   :  { %v69_v43 = vsub.f32 0.0, %v68_v42  ;;  %v81_v44 = vsel %vm78_vm4, %v77_v41, 0.0 }
 0x1df   :  { %v98_v45 = vsel %vm83_vm5, %v81_v44, 0.0 }
 0x1e0   :  { %99 = vadd.xlane.f32.xlu1 %v98_v45  ;;  %v84_v46 = vsel %vm83_vm5, %v69_v43, 0.0 }
 0x1e1   :  { %85 = vadd.xlane.f32.xlu0 %v84_v46 }
 0x1e5   :  { %113 = vadd.xlane.f32.xlu0 %v112_v48 }
 0x26d   :  { %v100_v49 = vpop.xlane.xlu1 %99 }
 0x26e   :  { %v101_v50 = vrot.slane %v100_v49, 4  ;;  %v86_v51 = vpop.xlane.xlu0 %85 }
 0x26f   :  { %v87_v52 = vrot.slane %v86_v51, 4 }
 0x270   :  { %v102_v53 = vadd.f32 %v101_v50, %v100_v49 }
 0x271   :  { %v88_v54 = vadd.f32 %v87_v52, %v86_v51 }
 0x272   :  { %v103_v55 = vrot.slane %v102_v53, 2  ;;  %v114_v56 = vpop.xlane.xlu0 %113 }
 0x273   :  { %v89_v57 = vrot.slane %v88_v54, 2  ;;  %v115_v58 = vrot.slane %v114_v56, 4 }
 0x274   :  { %v104_v59 = vadd.f32 %v103_v55, %v102_v53 }
 0x275   :  { %v116_v60 = vadd.f32 %v115_v58, %v114_v56  ;;  %v90_v61 = vadd.f32 %v89_v57, %v88_v54 }
 0x276   :  { %v105_v62 = vrot.slane %v104_v59, 1 }
 0x277   :  { %v117_v63 = vrot.slane %v116_v60, 2  ;;  %v91_v0 = vrot.slane %v90_v61, 1 }
 0x278   :  { %v106_v1 = vadd.f32 %v105_v62, %v104_v59 }
 0x279   :  { %v118_v2 = vadd.f32 %v117_v63, %v116_v60  ;;  %v92_v3 = vadd.f32 %v91_v0, %v90_v61 }
 0x27b   :  { %142 = vpush %v92_v3  ;;  %v119_v4 = vrot.slane %v118_v2, 1 }
 0x27c   :  { %144 = vpush %v106_v1 }
 0x27d   :  { %v120_v5 = vadd.f32 %v119_v4, %v118_v2 }
 0x27f   :  { %146 = vpush %v120_v5 }
 0x2ac   :  { %s143_s1 = spop %142 }
 0x2ad   :  { %s145_s12 = spop %144  ;;  %96 = sst [smem:[#allocation2]] %s143_s1 }
 0x2ae   :  { %110 = sst [smem:[#allocation2 + $0x1]] %s145_s12 }
 0x2b0   :  { %s147_s13 = spop %146 }
 0x2b1   :  { %124 = sst [smem:[#allocation2 + $0x2]] %s147_s13 }
 0x2b2   :  { %171 = shalt.err (!%p168_p2)
}
 0x2b3   :  { %s176_s21 = smov [#allocation2]  }
 0x2b4   :  { %132 = dma.smem_to_hbm %s176_s21, 16, %s217_s2, [#allocation3]  }
 0x2b5   :  { %172 = dma.done.wait [#allocation3], 16  }
 0x2b6   :  { %173 = vsyncadd [#allocation3], 4294967280 }
 0x2b7   :  { %136 = sfence }
 0x2b8   :  { %137 = vsyncpa [#allocation3], 1 }

</bundles_post_ra>
